<compile_context>
chip_gen: v7x
topology: tpu7x:2x2x1
jax: 0.10.0
libtpu: 0.0.40
codegen_flags: <defaults>
</compile_context>

<pallas_src>
import math

import jax
import jax.numpy as jnp
from jax.experimental import pallas as pl
from jax.experimental.pallas import tpu as pltpu


def _layerscale_kernel(x_ref, scale_ref, o_ref):
    # (tile_rows, tile_dim) * (1, tile_dim) broadcast multiply, native dtype.
    o_ref[...] = x_ref[...] * scale_ref[...]


def _sublane_packing(dtype) -> int:
    # 8 rows/vreg for 4-byte dtypes, 16 for 2-byte, 32 for 1-byte.
    bytes_per = jnp.dtype(dtype).itemsize
    return max(8, 32 // max(bytes_per, 1))


def _vmem_budget():
    """(target_block_bytes, vmem_limit_bytes), generation-aware."""
    cap = 128 * 1024 * 1024
    try:
        cap = int(getattr(pltpu.get_tpu_info(), "vmem_capacity_bytes", cap))
    except Exception:  # interpret mode / older runtimes: keep the default.
        pass
    if cap >= 96 * 1024 * 1024:          # v5e / v6e: 128 MiB VMEM
        return 8 * 1024 * 1024, 48 * 1024 * 1024
    # v7x: 64 MiB VMEM per TC, 3.2 TB/s HBM -> keep blocks large enough to
    # amortize per-grid-step overhead but leave headroom once input + output
    # are double-buffered.
    return 6 * 1024 * 1024, 40 * 1024 * 1024


def _lane_fold(rows: int, dim: int) -> int:
    """k rows folded into the lane axis so dim*k is lane-dense (mult of 128)."""
    if dim >= 128 or dim % 128 == 0 or rows <= 1:
        return 1
    k = 128 // math.gcd(dim, 128)        # smallest k with (dim * k) % 128 == 0
    if rows % k == 0:
        # Extend past 128 lanes (up to ~512) while rows stays divisible.
        while dim * k * 2 <= 512 and rows % (k * 2) == 0:
            k *= 2
        return k
    # Fallback: widest divisor of rows (<= 32) that still fits ~512 lanes
    # (not an exact 128-multiple, but far fewer masked lanes than k = 1).
    best = 1
    for cand in range(2, 33):
        if rows % cand == 0 and dim * cand <= 512:
            best = cand
    return best


def layer_scale(x: jax.Array, scale: jax.Array) -> jax.Array:
    """LayerScale forward: x * scale, where scale has shape (x.shape[-1],)."""
    orig_shape = x.shape
    dim = orig_shape[-1]
    assert scale.shape == (dim,), f"scale must be ({dim},), got {scale.shape}"

    rows = 1
    for s in orig_shape[:-1]:
        rows *= s

    k = _lane_fold(rows, dim)
    rows_eff = rows // k
    dim_eff = dim * k

    x2 = x.reshape(rows_eff, dim_eff)
    scale_x = scale.astype(x.dtype)
    scale2 = (jnp.tile(scale_x, k) if k > 1 else scale_x).reshape(1, dim_eff)

    bytes_per = jnp.dtype(x.dtype).itemsize
    packing = _sublane_packing(x.dtype)
    target_block_bytes, vmem_limit = _vmem_budget()

    row_bytes = dim_eff * bytes_per
    if row_bytes * packing <= target_block_bytes:
        # Full-width rows: tile only the row axis.
        tile_dim = dim_eff
        tile_rows = max(packing,
                        (target_block_bytes // row_bytes) // packing * packing)
    else:
        # Very wide hidden dim: also tile the lane axis in multiples of 128.
        tile_rows = packing
        tile_dim = max(128,
                       (target_block_bytes // (packing * bytes_per)) // 128 * 128)
        tile_dim = min(tile_dim, dim_eff)

    if rows_eff <= packing:
        tile_rows = rows_eff                 # single (possibly short) row block
    else:
        # Keep at least 2 row blocks so both v7x TensorCores get work; also
        # caps the block when everything would otherwise fit in one.
        half = (rows_eff + 1) // 2
        half_rows = ((half + packing - 1) // packing) * packing
        tile_rows = min(tile_rows, half_rows)

    grid = (pl.cdiv(rows_eff, tile_rows), pl.cdiv(dim_eff, tile_dim))

    cost = pl.CostEstimate(
        flops=rows_eff * dim_eff,
        transcendentals=0,
        bytes_accessed=2 * rows_eff * dim_eff * bytes_per + dim_eff * bytes_per,
    )

    out = pl.pallas_call(
        _layerscale_kernel,
        out_shape=jax.ShapeDtypeStruct((rows_eff, dim_eff), x.dtype),
        grid_spec=pltpu.PrefetchScalarGridSpec(
            num_scalar_prefetch=0,
            grid=grid,
            in_specs=[
                pl.BlockSpec((tile_rows, tile_dim), lambda i, j: (i, j)),
                # One scale row per lane block; constant over the row axis so
                # it stays resident across row iterations.
                pl.BlockSpec((1, tile_dim), lambda i, j: (0, j)),
            ],
            out_specs=pl.BlockSpec((tile_rows, tile_dim), lambda i, j: (i, j)),
        ),
        compiler_params=pltpu.CompilerParams(
            dimension_semantics=("parallel", "parallel"),
            vmem_limit_bytes=vmem_limit,
        ),
        cost_estimate=cost,
    )(x2, scale2)

    return out.reshape(orig_shape)


if __name__ == "__main__":
    key = jax.random.PRNGKey(0)
    init_value = 0.1

    # Small demo mirroring nn.Parameter(torch.ones(dim) * init_value).
    B, N, D = 2, 8, 32
    scale = jnp.ones((D,), dtype=jnp.float32) * init_value
    k1, k2 = jax.random.split(key)
    x = jax.random.normal(k1, (B, N, D), dtype=jnp.float32)

    y = jax.block_until_ready(layer_scale(x, scale))
    y_ref = x * scale
    assert jnp.allclose(y, y_ref, atol=1e-6, rtol=1e-6), "mismatch (small)"

    # Multi-block grid with a ragged last row block (no padding path).
    B2, N2, D2 = 2, 4500, 256
    scale_l = jnp.ones((D2,), dtype=jnp.float32) * init_value
    x_l = jax.random.normal(k2, (B2, N2, D2), dtype=jnp.float32)
    y_l = jax.block_until_ready(layer_scale(x_l, scale_l))
    assert jnp.allclose(y_l, x_l * scale_l, atol=1e-6, rtol=1e-6), "mismatch (large)"

    # Lane-dense fold path (dim=48 -> 384 lanes) with bf16 activations.
    B3, N3, D3 = 2, 16, 48
    scale_s = jnp.ones((D3,), dtype=jnp.float32) * init_value
    x_s = jax.random.normal(k1, (B3, N3, D3), dtype=jnp.bfloat16)
    y_s = jax.block_until_ready(layer_scale(x_s, scale_s))
    y_s_ref = x_s * scale_s.astype(jnp.bfloat16)
    assert jnp.allclose(y_s.astype(jnp.float32), y_s_ref.astype(jnp.float32),
                        atol=1e-2, rtol=1e-2), "mismatch (bf16 fold)"

    print("KERNEL_OK")
</pallas_src>

<mosaic_0001>
module attributes {stable_mosaic.version = 11 : i64} {
  func.func @_layerscale_kernel(%arg0: i32, %arg1: i32, %arg2: memref<1x512xf32, #tpu.memory_space<vmem>>, %arg3: memref<1x512xf32, #tpu.memory_space<vmem>>, %arg4: memref<1x512xf32, #tpu.memory_space<vmem>>) attributes {dimension_semantics = [#tpu.dimension_semantics<parallel>, #tpu.dimension_semantics<parallel>], iteration_bounds = array<i64: 1, 1>, scalar_prefetch = 0 : i64, scratch_operands = 0 : i64, tpu.core_type = #tpu.core_type<tc>, window_params = [{transform_indices = @transform_0, window_bounds = array<i64: 1, 512>}, {transform_indices = @transform_1, window_bounds = array<i64: 1, 512>}, {transform_indices = @transform_2, window_bounds = array<i64: 1, 512>}]} {
    %c0 = arith.constant 0 : index
    %c0_0 = arith.constant 0 : index
    %0 = vector.load %arg2[%c0, %c0_0] : memref<1x512xf32, #tpu.memory_space<vmem>>, vector<1x512xf32>
    %c0_1 = arith.constant 0 : index
    %c0_2 = arith.constant 0 : index
    %1 = vector.load %arg3[%c0_1, %c0_2] : memref<1x512xf32, #tpu.memory_space<vmem>>, vector<1x512xf32>
    %2 = arith.mulf %0, %1 : vector<1x512xf32>
    %c0_3 = arith.constant 0 : index
    %c0_4 = arith.constant 0 : index
    %3 = vector.load %arg4[%c0_3, %c0_4] : memref<1x512xf32, #tpu.memory_space<vmem>>, vector<1x512xf32>
    tpu.vector_store %arg4[%c0_3, %c0_4], %2 {strides = array<i32>} : memref<1x512xf32, #tpu.memory_space<vmem>>, vector<1x512xf32>,
    return
  }
  func.func @transform_0(%arg0: i32, %arg1: i32) -> (i32, i32) {
    %c0_i32 = arith.constant 0 : i32
    return %arg0, %arg1 : i32, i32
  }
  func.func @transform_1(%arg0: i32, %arg1: i32) -> (i32, i32) {
    %c0_i32 = arith.constant 0 : i32
    %c0_i32_0 = arith.constant 0 : i32
    return %c0_i32, %arg1 : i32, i32
  }
  func.func @transform_2(%arg0: i32, %arg1: i32) -> (i32, i32) {
    %c0_i32 = arith.constant 0 : i32
    return %arg0, %arg1 : i32, i32
  }
}

</mosaic_0001>

<bundles_post_ra>
// kernel: tpu_custom_call.1
= control target key start
LH: loop header
LB: loop body
LE: loop exit
PB: predicated region body
PF: predicated region fallthrough
CT: control target
= control target key end

     0   :  { %7 = vsyncpa [#allocation3], 0  ;;  %s189_s0 = inlined_call_operand.hbm [shape: f32[1,512], index: 0, kind: input, shape index: {}]   ;;  %s190_s1 = inlined_call_operand.hbm [shape: f32[1,512], index: 1, kind: input, shape index: {}]   ;;  %s191_s2 = inlined_call_operand.hbm [shape: f32[1,512], index: 2, kind: output, shape index: {}]  }
   0x1   :  { %8 = vsyncpa [#allocation6], 0 }
   0x2   :  { %9 = vsyncpa [#allocation4], 0  ;;  %s135_s9 = smov [#allocation2]   ;;  %s136_s11 = smov [#allocation5]  }
   0x3   :  { %s16_s10 = sshll.u32 %s135_s9, 4  ;;  %s26_s12 = sshll.u32 %s136_s11, 4  ;;  %s17_s10 = int_to_ptr.vmem [resolvable:$true] %s16_s10  ;;  %s27_s12 = int_to_ptr.vmem [resolvable:$true] %s26_s12 }
   0x4   :  { %s63_s15 = scalar_lea.hbm %s189_s0, 64 }
   0x5   :  { %p64_p0 = scmp.ne.s32.totalorder %s189_s0, %s63_s15  ;;  %p67_p1 = scmp.lt.u32.totalorder %s63_s15, %s189_s0 }
   0x7   :  { %p69_p2 = pnand %p67_p1, %p64_p0 }
   0x9   :  { %72 = shalt.err (!%p69_p2)
}
   0xa   :  { %s73_s20 = scalar_lea.vmem %s17_s10, 64  ;;  %p78_p4 = scmp.lt.s32.totalorder %s17_s10, %s17_s10 }
   0xb   :  { %p74_p3 = scmp.ne.s32.totalorder %s17_s10, %s73_s20  ;;  %p79_p5 = scmp.lt.s32.totalorder %s73_s20, %s73_s20 }
   0xd   :  { %p80_p6 = por %p79_p5, %p78_p4 }
   0xf   :  { %p81_p7 = pnand %p80_p6, %p74_p3 }
  0x11   :  { %84 = shalt.err (!%p81_p7)
}
  0x12   :  { %19 = dma.hbm_to_vmem [thread:$0]  %s189_s0, 64, %s17_s10, [#allocation3]  }
  0x13   :  { %s85_s25 = scalar_lea.hbm %s190_s1, 64 }
  0x14   :  { %p86_p8 = scmp.ne.s32.totalorder %s190_s1, %s85_s25  ;;  %p89_p9 = scmp.lt.u32.totalorder %s85_s25, %s190_s1 }
  0x16   :  { %p91_p10 = pnand %p89_p9, %p86_p8 }
  0x18   :  { %94 = shalt.err (!%p91_p10)
}
  0x19   :  { %s95_s30 = scalar_lea.vmem %s27_s12, 64  ;;  %p100_p12 = scmp.lt.s32.totalorder %s27_s12, %s27_s12 }
  0x1a   :  { %p96_p11 = scmp.ne.s32.totalorder %s27_s12, %s95_s30  ;;  %p101_p13 = scmp.lt.s32.totalorder %s95_s30, %s95_s30 }
  0x1c   :  { %p102_p0 = por %p101_p13, %p100_p12 }
  0x1e   :  { %p103_p1 = pnand %p102_p0, %p96_p11 }
  0x20   :  { %106 = shalt.err (!%p103_p1)
}
  0x21   :  { %29 = dma.hbm_to_vmem [thread:$0]  %s190_s1, 64, %s27_s12, [#allocation6]  }
  0x22   :  { %129 = dma.done.wait [#allocation3], 64  }
  0x23   :  { %130 = vsyncadd [#allocation3], 4294967232 }
  0x24   :  { %131 = dma.done.wait [#allocation6], 64  }
  0x25   :  { %132 = vsyncadd [#allocation6], 4294967232  ;;  %v39_v0 = vlaneseq  ;;  %s137_s4 = smov [#allocation7]   ;;  %v36_v1 = vld [vmem:[#allocation2] sm:$0xf] }
  0x26   :  { %s50_s5 = sshll.u32 %s137_s4, 4  ;;  %v37_v2 = vld [vmem:[#allocation5] sm:$0xf]  ;;  %s51_s5 = int_to_ptr.vmem [resolvable:$true] %s50_s5 }
  0x27   :  { %vm41_vm0 = vcmp.lt.s32.totalorder %v39_v0, 512  ;;  %v38_v3 = vmul.f32 %v37_v2, %v36_v1  ;;  %s107_s6 = scalar_lea.vmem %s51_s5, 64  ;;  %p112_p3 = scmp.lt.s32.totalorder %s51_s5, %s51_s5 }
  0x28   :  { %p108_p2 = scmp.ne.s32.totalorder %s51_s5, %s107_s6  ;;  %p113_p4 = scmp.lt.s32.totalorder %s107_s6, %s107_s6 }
  0x29   :  { %43 = vst.msk [vmem:[#allocation7] sm:$0xf] %vm41_vm0, %v38_v3 }
  0x2a   :  { %p114_p5 = por %p113_p4, %p112_p3 }
  0x2c   :  { %p115_p6 = pnand %p114_p5, %p108_p2 }
  0x2e   :  { %118 = shalt.err (!%p115_p6)
}
  0x2f   :  { %s119_s8 = scalar_lea.hbm %s191_s2, 64 }
  0x30   :  { %p120_p7 = scmp.ne.s32.totalorder %s191_s2, %s119_s8  ;;  %p123_p8 = scmp.lt.u32.totalorder %s119_s8, %s191_s2 }
  0x32   :  { %p125_p9 = pnand %p123_p8, %p120_p7 }
  0x34   :  { %128 = shalt.err (!%p125_p9)
}
  0x35   :  { %53 = dma.vmem_to_hbm [thread:$0]  %s51_s5, 64, %s191_s2, [#allocation4]  }
  0x36   :  { %133 = dma.done.wait [#allocation4], 64  }
  0x37   :  { %134 = vsyncadd [#allocation4], 4294967232 }
  0x38   :  { %57 = vsyncpa [#allocation3], 1 }
  0x39   :  { %58 = vsyncpa [#allocation6], 1 }
  0x3a   :  { %59 = vsyncpa [#allocation4], 1 }

</bundles_post_ra>
